<compile_context>
chip_gen: v7x
topology: tpu7x:2x2x1
jax: 0.10.0
libtpu: 0.0.40
codegen_flags: <defaults>
</compile_context>

<pallas_src>
import jax
import jax.numpy as jnp
from jax.experimental import pallas as pl
from jax.experimental.pallas import tpu as pltpu

_GATE_PAD = 128  # per-gate lane block (one vreg lane width)


def lstm_ts_kernel(x_ref, h0_ref, c0_ref, wih_ref, whh_ref, b_ref,
                   wfc_ref, bfc_ref,
                   out_ref, hn_ref, cn_ref,
                   hseq_scr):
    seq = x_ref.shape[0]
    H = h0_ref.shape[1]
    HP = whh_ref.shape[1] // 4          # padded per-gate block width (128)

    # ---- Prologue: hoist the input projection out of the recurrence.
    # One (seq, I) x (I, 4*HP) matmul + bias add covers every timestep.
    gx = (jnp.dot(x_ref[...], wih_ref[...],
                  preferred_element_type=jnp.float32)
          + b_ref[...])                                        # (seq, 4*HP)

    # Loop-invariant recurrent weight, hoisted out of step().
    whh = whh_ref[...].astype(jnp.float32)                     # (H, 4*HP)

    h = h0_ref[...].astype(jnp.float32)                        # (1, H)
    c = c0_ref[...].astype(jnp.float32)                        # (1, H)

    # Serial recurrence.  Fully unrolled static loop (seq is small); for long seq use a
    # seq grid axis + partially-unrolled fori_loop instead.
    for t in range(seq):
        gates = (gx[t:t + 1, :]
                 + jnp.dot(h, whh,
                           preferred_element_type=jnp.float32))  # (1, 4*HP)
        # Each gate occupies its own 128-lane block, so all four slices start at lane
        # offset 0 of their vreg: no XLU lane rotations on the serial h/c chain.
        i_g = jax.nn.sigmoid(gates[:, 0 * HP:0 * HP + H])
        f_g = jax.nn.sigmoid(gates[:, 1 * HP:1 * HP + H])
        g_g = jnp.tanh(gates[:, 2 * HP:2 * HP + H])
        o_g = jax.nn.sigmoid(gates[:, 3 * HP:3 * HP + H])
        c = f_g * c + i_g * g_g
        h = o_g * jnp.tanh(c)
        # Row store is off the critical path (recurrence carries h/c in vregs).
        hseq_scr[t:t + 1, :] = h

    # ---- Epilogue: batched FC + sigmoid, single store.
    # (Lane-dense (1, seq) output only pays off at long seq; negligible at seq=8.)
    out_ref[...] = jax.nn.sigmoid(
        jnp.dot(hseq_scr[...], wfc_ref[...],
                preferred_element_type=jnp.float32)
        + bfc_ref[...]).astype(out_ref.dtype)                  # (seq, O)
    hn_ref[...] = h.astype(hn_ref.dtype)
    cn_ref[...] = c.astype(cn_ref.dtype)


def _pad_gates(w, H, HP=_GATE_PAD):
    """Pad each of the 4 gate blocks (PyTorch order i,f,g,o) from H to HP rows with zeros.

    Works for 2-D weights (4H, X) -> (4*HP, X) and 1-D biases (4H,) -> (4*HP,)."""
    blocks = []
    for g in range(4):
        blk = w[g * H:(g + 1) * H]
        pad = jnp.zeros((HP - H,) + w.shape[1:], w.dtype)
        blocks.append(jnp.concatenate([blk, pad], axis=0))
    return jnp.concatenate(blocks, axis=0)


def lstm_ts_forward(x, hprev, cprev, params):
    """x: (seq, input_size); hprev/cprev: (1, 1, hidden).
    Returns (out (seq, output_size), (h_n (1,1,H), c_n (1,1,H)))."""
    seq, _ = x.shape
    H = params["w_hh"].shape[1]
    O = params["w_fc"].shape[0]
    HP = _GATE_PAD
    assert H <= HP, "hidden size must fit one 128-lane gate block"

    # Gate-padded layouts: each gate gets its own 128-lane column block.
    wih_t = _pad_gates(params["w_ih"], H).T                      # (I, 4*HP)
    whh_t = _pad_gates(params["w_hh"], H).T                      # (H, 4*HP)
    bias = _pad_gates(params["b_ih"] + params["b_hh"], H).reshape(1, 4 * HP)
    wfc_t = params["w_fc"].T                                     # (H, O)
    bfc = params["b_fc"].reshape(1, O)

    h0 = hprev.reshape(1, H)
    c0 = cprev.reshape(1, H)

    vmem = pl.BlockSpec(memory_space=pltpu.MemorySpace.VMEM)
    out, h_n, c_n = pl.pallas_call(
        lstm_ts_kernel,
        out_shape=(
            jax.ShapeDtypeStruct((seq, O), jnp.float32),
            jax.ShapeDtypeStruct((1, H), jnp.float32),
            jax.ShapeDtypeStruct((1, H), jnp.float32),
        ),
        in_specs=[vmem] * 8,
        out_specs=(vmem, vmem, vmem),
        scratch_shapes=[
            pltpu.VMEM((seq, H), jnp.float32),   # per-step hidden states for batched FC
        ],
        compiler_params=pltpu.CompilerParams(
            vmem_limit_bytes=32 * 1024 * 1024),
    )(x, h0, c0, wih_t, whh_t, bias, wfc_t, bfc)

    return out, (h_n.reshape(1, 1, H), c_n.reshape(1, 1, H))


def lstm_ts_reference(x, hprev, cprev, params):
    """Pure-JAX reference reproducing PyTorch nn.LSTM + Linear + sigmoid."""
    H = params["w_hh"].shape[1]
    h = hprev.reshape(1, H)
    c = cprev.reshape(1, H)
    outs = []
    for t in range(x.shape[0]):
        x_t = x[t:t + 1]
        gates = (x_t @ params["w_ih"].T + params["b_ih"]
                 + h @ params["w_hh"].T + params["b_hh"])
        i_g = jax.nn.sigmoid(gates[:, 0:H])
        f_g = jax.nn.sigmoid(gates[:, H:2 * H])
        g_g = jnp.tanh(gates[:, 2 * H:3 * H])
        o_g = jax.nn.sigmoid(gates[:, 3 * H:4 * H])
        c = f_g * c + i_g * g_g
        h = o_g * jnp.tanh(c)
        outs.append(h)
    lstm_out = jnp.concatenate(outs, axis=0)                       # (seq, H)
    out = jax.nn.sigmoid(lstm_out @ params["w_fc"].T + params["b_fc"])
    return out, (h.reshape(1, 1, H), c.reshape(1, 1, H))


def init_params(key, input_size, hidden, output_size):
    """Deterministic init with PyTorch-like shapes (uniform +-1/sqrt(H))."""
    ks = jax.random.split(key, 6)
    s = 1.0 / jnp.sqrt(hidden)
    u = lambda k, shp: jax.random.uniform(k, shp, jnp.float32, -s, s)
    return {
        "w_ih": u(ks[0], (4 * hidden, input_size)),
        "w_hh": u(ks[1], (4 * hidden, hidden)),
        "b_ih": u(ks[2], (4 * hidden,)),
        "b_hh": u(ks[3], (4 * hidden,)),
        "w_fc": u(ks[4], (output_size, hidden)),
        "b_fc": u(ks[5], (output_size,)),
    }


if __name__ == "__main__":
    # Small shapes consistent with the module: input_size=2, output_size=1, hidden=32.
    seq, input_size, hidden, output_size = 8, 2, 32, 1

    key = jax.random.PRNGKey(0)
    k_p, k_x, k_h, k_c = jax.random.split(key, 4)

    params = init_params(k_p, input_size, hidden, output_size)
    x = jax.random.normal(k_x, (seq, input_size), jnp.float32)
    hprev = jax.random.normal(k_h, (1, 1, hidden), jnp.float32)
    cprev = jax.random.normal(k_c, (1, 1, hidden), jnp.float32)

    out, (h_n, c_n) = lstm_ts_forward(x, hprev, cprev, params)
    jax.block_until_ready((out, h_n, c_n))

    out_ref, (h_ref, c_ref) = lstm_ts_reference(x, hprev, cprev, params)
    assert jnp.allclose(out, out_ref, atol=1e-5), "output mismatch"
    assert jnp.allclose(h_n, h_ref, atol=1e-5), "h_n mismatch"
    assert jnp.allclose(c_n, c_ref, atol=1e-5), "c_n mismatch"

    print("KERNEL_OK")
</pallas_src>

<mosaic_0001>
module attributes {stable_mosaic.version = 11 : i64} {
  func.func @lstm_ts_kernel(%arg0: memref<8x2xf32, #tpu.memory_space<vmem>>, %arg1: memref<1x32xf32, #tpu.memory_space<vmem>>, %arg2: memref<1x32xf32, #tpu.memory_space<vmem>>, %arg3: memref<2x512xf32, #tpu.memory_space<vmem>>, %arg4: memref<32x512xf32, #tpu.memory_space<vmem>>, %arg5: memref<1x512xf32, #tpu.memory_space<vmem>>, %arg6: memref<32x1xf32, #tpu.memory_space<vmem>>, %arg7: memref<1x1xf32, #tpu.memory_space<vmem>>, %arg8: memref<8x1xf32, #tpu.memory_space<vmem>>, %arg9: memref<1x32xf32, #tpu.memory_space<vmem>>, %arg10: memref<1x32xf32, #tpu.memory_space<vmem>>, %arg11: memref<8x32xf32, #tpu.memory_space<vmem>>) attributes {dimension_semantics = [], scalar_prefetch = 0 : i64, scratch_operands = 1 : i64, tpu.core_type = #tpu.core_type<tc>} {
    %c0 = arith.constant 0 : index
    %c0_0 = arith.constant 0 : index
    %0 = vector.load %arg0[%c0, %c0_0] : memref<8x2xf32, #tpu.memory_space<vmem>>, vector<8x2xf32>
    %c0_1 = arith.constant 0 : index
    %c0_2 = arith.constant 0 : index
    %1 = vector.load %arg3[%c0_1, %c0_2] : memref<2x512xf32, #tpu.memory_space<vmem>>, vector<2x512xf32>
    %cst = arith.constant dense<0.000000e+00> : vector<8x512xf32>
    %2 = tpu.matmul %0, %1, %cst {dimension_numbers = #tpu.dot_dimension_numbers<[1], [0], [0], [1], [0, 0, 1, 1], [], []>} : vector<8x2xf32>, vector<2x512xf32>, vector<8x512xf32> -> vector<8x512xf32>
    %c0_3 = arith.constant 0 : index
    %c0_4 = arith.constant 0 : index
    %3 = vector.load %arg5[%c0_3, %c0_4] : memref<1x512xf32, #tpu.memory_space<vmem>>, vector<1x512xf32>
    %4 = vector.broadcast %3 : vector<1x512xf32> to vector<8x512xf32>
    %5 = arith.addf %2, %4 : vector<8x512xf32>
    %c0_5 = arith.constant 0 : index
    %c0_6 = arith.constant 0 : index
    %6 = vector.load %arg4[%c0_5, %c0_6] : memref<32x512xf32, #tpu.memory_space<vmem>>, vector<32x512xf32>
    %c0_7 = arith.constant 0 : index
    %c0_8 = arith.constant 0 : index
    %7 = vector.load %arg1[%c0_7, %c0_8] : memref<1x32xf32, #tpu.memory_space<vmem>>, vector<1x32xf32>
    %c0_9 = arith.constant 0 : index
    %c0_10 = arith.constant 0 : index
    %8 = vector.load %arg2[%c0_9, %c0_10] : memref<1x32xf32, #tpu.memory_space<vmem>>, vector<1x32xf32>
    %9 = vector.extract_strided_slice %5 {offsets = [0, 0], sizes = [1, 512], strides = [1, 1]} : vector<8x512xf32> to vector<1x512xf32>
    %cst_11 = arith.constant dense<0.000000e+00> : vector<1x512xf32>
    %10 = tpu.matmul %7, %6, %cst_11 {dimension_numbers = #tpu.dot_dimension_numbers<[1], [0], [0], [1], [0, 0, 1, 1], [], []>} : vector<1x32xf32>, vector<32x512xf32>, vector<1x512xf32> -> vector<1x512xf32>
    %11 = arith.addf %9, %10 : vector<1x512xf32>
    %12 = vector.extract_strided_slice %11 {offsets = [0, 0], sizes = [1, 32], strides = [1, 1]} : vector<1x512xf32> to vector<1x32xf32>
    %13 = arith.negf %12 : vector<1x32xf32>
    %14 = math.exp %13 : vector<1x32xf32>
    %cst_12 = arith.constant 1.000000e+00 : f32
    %15 = vector.broadcast %cst_12 : f32 to vector<1x32xf32>
    %16 = arith.addf %15, %14 : vector<1x32xf32>
    %17 = arith.divf %15, %16 : vector<1x32xf32>
    %18 = vector.extract_strided_slice %11 {offsets = [0, 128], sizes = [1, 32], strides = [1, 1]} : vector<1x512xf32> to vector<1x32xf32>
    %19 = arith.negf %18 : vector<1x32xf32>
    %20 = math.exp %19 : vector<1x32xf32>
    %cst_13 = arith.constant 1.000000e+00 : f32
    %21 = vector.broadcast %cst_13 : f32 to vector<1x32xf32>
    %22 = arith.addf %21, %20 : vector<1x32xf32>
    %23 = arith.divf %21, %22 : vector<1x32xf32>
    %24 = vector.extract_strided_slice %11 {offsets = [0, 256], sizes = [1, 32], strides = [1, 1]} : vector<1x512xf32> to vector<1x32xf32>
    %25 = math.tanh %24 : vector<1x32xf32>
    %26 = vector.extract_strided_slice %11 {offsets = [0, 384], sizes = [1, 32], strides = [1, 1]} : vector<1x512xf32> to vector<1x32xf32>
    %27 = arith.negf %26 : vector<1x32xf32>
    %28 = math.exp %27 : vector<1x32xf32>
    %cst_14 = arith.constant 1.000000e+00 : f32
    %29 = vector.broadcast %cst_14 : f32 to vector<1x32xf32>
    %30 = arith.addf %29, %28 : vector<1x32xf32>
    %31 = arith.divf %29, %30 : vector<1x32xf32>
    %32 = arith.mulf %23, %8 : vector<1x32xf32>
    %33 = arith.mulf %17, %25 : vector<1x32xf32>
    %34 = arith.addf %32, %33 : vector<1x32xf32>
    %35 = math.tanh %34 : vector<1x32xf32>
    %36 = arith.mulf %31, %35 : vector<1x32xf32>
    %c0_15 = arith.constant 0 : index
    %c0_16 = arith.constant 0 : index
    %37 = vector.load %arg11[%c0_15, %c0_16] : memref<8x32xf32, #tpu.memory_space<vmem>>, vector<1x32xf32>
    tpu.vector_store %arg11[%c0_15, %c0_16], %36 {strides = array<i32>} : memref<8x32xf32, #tpu.memory_space<vmem>>, vector<1x32xf32>,
    %38 = vector.extract_strided_slice %5 {offsets = [1, 0], sizes = [1, 512], strides = [1, 1]} : vector<8x512xf32> to vector<1x512xf32>
    %cst_17 = arith.constant dense<0.000000e+00> : vector<1x512xf32>
    %39 = tpu.matmul %36, %6, %cst_17 {dimension_numbers = #tpu.dot_dimension_numbers<[1], [0], [0], [1], [0, 0, 1, 1], [], []>} : vector<1x32xf32>, vector<32x512xf32>, vector<1x512xf32> -> vector<1x512xf32>
    %40 = arith.addf %38, %39 : vector<1x512xf32>
    %41 = vector.extract_strided_slice %40 {offsets = [0, 0], sizes = [1, 32], strides = [1, 1]} : vector<1x512xf32> to vector<1x32xf32>
    %42 = arith.negf %41 : vector<1x32xf32>
    %43 = math.exp %42 : vector<1x32xf32>
    %cst_18 = arith.constant 1.000000e+00 : f32
    %44 = vector.broadcast %cst_18 : f32 to vector<1x32xf32>
    %45 = arith.addf %44, %43 : vector<1x32xf32>
    %46 = arith.divf %44, %45 : vector<1x32xf32>
    %47 = vector.extract_strided_slice %40 {offsets = [0, 128], sizes = [1, 32], strides = [1, 1]} : vector<1x512xf32> to vector<1x32xf32>
    %48 = arith.negf %47 : vector<1x32xf32>
    %49 = math.exp %48 : vector<1x32xf32>
    %cst_19 = arith.constant 1.000000e+00 : f32
    %50 = vector.broadcast %cst_19 : f32 to vector<1x32xf32>
    %51 = arith.addf %50, %49 : vector<1x32xf32>
    %52 = arith.divf %50, %51 : vector<1x32xf32>
    %53 = vector.extract_strided_slice %40 {offsets = [0, 256], sizes = [1, 32], strides = [1, 1]} : vector<1x512xf32> to vector<1x32xf32>
    %54 = math.tanh %53 : vector<1x32xf32>
    %55 = vector.extract_strided_slice %40 {offsets = [0, 384], sizes = [1, 32], strides = [1, 1]} : vector<1x512xf32> to vector<1x32xf32>
    %56 = arith.negf %55 : vector<1x32xf32>
    %57 = math.exp %56 : vector<1x32xf32>
    %cst_20 = arith.constant 1.000000e+00 : f32
    %58 = vector.broadcast %cst_20 : f32 to vector<1x32xf32>
    %59 = arith.addf %58, %57 : vector<1x32xf32>
    %60 = arith.divf %58, %59 : vector<1x32xf32>
    %61 = arith.mulf %52, %34 : vector<1x32xf32>
    %62 = arith.mulf %46, %54 : vector<1x32xf32>
    %63 = arith.addf %61, %62 : vector<1x32xf32>
    %64 = math.tanh %63 : vector<1x32xf32>
    %65 = arith.mulf %60, %64 : vector<1x32xf32>
    %c1 = arith.constant 1 : index
    %c0_21 = arith.constant 0 : index
    %66 = vector.load %arg11[%c1, %c0_21] : memref<8x32xf32, #tpu.memory_space<vmem>>, vector<1x32xf32>
    tpu.vector_store %arg11[%c1, %c0_21], %65 {strides = array<i32>} : memref<8x32xf32, #tpu.memory_space<vmem>>, vector<1x32xf32>,
    %67 = vector.extract_strided_slice %5 {offsets = [2, 0], sizes = [1, 512], strides = [1, 1]} : vector<8x512xf32> to vector<1x512xf32>
    %cst_22 = arith.constant dense<0.000000e+00> : vector<1x512xf32>
    %68 = tpu.matmul %65, %6, %cst_22 {dimension_numbers = #tpu.dot_dimension_numbers<[1], [0], [0], [1], [0, 0, 1, 1], [], []>} : vector<1x32xf32>, vector<32x512xf32>, vector<1x512xf32> -> vector<1x512xf32>
    %69 = arith.addf %67, %68 : vector<1x512xf32>
    %70 = vector.extract_strided_slice %69 {offsets = [0, 0], sizes = [1, 32], strides = [1, 1]} : vector<1x512xf32> to vector<1x32xf32>
    %71 = arith.negf %70 : vector<1x32xf32>
    %72 = math.exp %71 : vector<1x32xf32>
    %cst_23 = arith.constant 1.000000e+00 : f32
    %73 = vector.broadcast %cst_23 : f32 to vector<1x32xf32>
    %74 = arith.addf %73, %72 : vector<1x32xf32>
    %75 = arith.divf %73, %74 : vector<1x32xf32>
    %76 = vector.extract_strided_slice %69 {offsets = [0, 128], sizes = [1, 32], strides = [1, 1]} : vector<1x512xf32> to vector<1x32xf32>
    %77 = arith.negf %76 : vector<1x32xf32>
    %78 = math.exp %77 : vector<1x32xf32>
    %cst_24 = arith.constant 1.000000e+00 : f32
    %79 = vector.broadcast %cst_24 : f32 to vector<1x32xf32>
    %80 = arith.addf %79, %78 : vector<1x32xf32>
    %81 = arith.divf %79, %80 : vector<1x32xf32>
    %82 = vector.extract_strided_slice %69 {offsets = [0, 256], sizes = [1, 32], strides = [1, 1]} : vector<1x512xf32> to vector<1x32xf32>
    %83 = math.tanh %82 : vector<1x32xf32>
    %84 = vector.extract_strided_slice %69 {offsets = [0, 384], sizes = [1, 32], strides = [1, 1]} : vector<1x512xf32> to vector<1x32xf32>
    %85 = arith.negf %84 : vector<1x32xf32>
    %86 = math.exp %85 : vector<1x32xf32>
    %cst_25 = arith.constant 1.000000e+00 : f32
    %87 = vector.broadcast %cst_25 : f32 to vector<1x32xf32>
    %88 = arith.addf %87, %86 : vector<1x32xf32>
    %89 = arith.divf %87, %88 : vector<1x32xf32>
    %90 = arith.mulf %81, %63 : vector<1x32xf32>
    %91 = arith.mulf %75, %83 : vector<1x32xf32>
    %92 = arith.addf %90, %91 : vector<1x32xf32>
    %93 = math.tanh %92 : vector<1x32xf32>
    %94 = arith.mulf %89, %93 : vector<1x32xf32>
    %c2 = arith.constant 2 : index
    %c0_26 = arith.constant 0 : index
    %95 = vector.load %arg11[%c2, %c0_26] : memref<8x32xf32, #tpu.memory_space<vmem>>, vector<1x32xf32>
    tpu.vector_store %arg11[%c2, %c0_26], %94 {strides = array<i32>} : memref<8x32xf32, #tpu.memory_space<vmem>>, vector<1x32xf32>,
    %96 = vector.extract_strided_slice %5 {offsets = [3, 0], sizes = [1, 512], strides = [1, 1]} : vector<8x512xf32> to vector<1x512xf32>
    %cst_27 = arith.constant dense<0.000000e+00> : vector<1x512xf32>
    %97 = tpu.matmul %94, %6, %cst_27 {dimension_numbers = #tpu.dot_dimension_numbers<[1], [0], [0], [1], [0, 0, 1, 1], [], []>} : vector<1x32xf32>, vector<32x512xf32>, vector<1x512xf32> -> vector<1x512xf32>
    %98 = arith.addf %96, %97 : vector<1x512xf32>
    %99 = vector.extract_strided_slice %98 {offsets = [0, 0], sizes = [1, 32], strides = [1, 1]} : vector<1x512xf32> to vector<1x32xf32>
    %100 = arith.negf %99 : vector<1x32xf32>
    %101 = math.exp %100 : vector<1x32xf32>
    %cst_28 = arith.constant 1.000000e+00 : f32
    %102 = vector.broadcast %cst_28 : f32 to vector<1x32xf32>
    %103 = arith.addf %102, %101 : vector<1x32xf32>
    %104 = arith.divf %102, %103 : vector<1x32xf32>
    %105 = vector.extract_strided_slice %98 {offsets = [0, 128], sizes = [1, 32], strides = [1, 1]} : vector<1x512xf32> to vector<1x32xf32>
    %106 = arith.negf %105 : vector<1x32xf32>
    %107 = math.exp %106 : vector<1x32xf32>
    %cst_29 = arith.constant 1.000000e+00 : f32
    %108 = vector.broadcast %cst_29 : f32 to vector<1x32xf32>
    %109 = arith.addf %108, %107 : vector<1x32xf32>
    %110 = arith.divf %108, %109 : vector<1x32xf32>
    %111 = vector.extract_strided_slice %98 {offsets = [0, 256], sizes = [1, 32], strides = [1, 1]} : vector<1x512xf32> to vector<1x32xf32>
    %112 = math.tanh %111 : vector<1x32xf32>
    %113 = vector.extract_strided_slice %98 {offsets = [0, 384], sizes = [1, 32], strides = [1, 1]} : vector<1x512xf32> to vector<1x32xf32>
    %114 = arith.negf %113 : vector<1x32xf32>
    %115 = math.exp %114 : vector<1x32xf32>
    %cst_30 = arith.constant 1.000000e+00 : f32
    %116 = vector.broadcast %cst_30 : f32 to vector<1x32xf32>
    %117 = arith.addf %116, %115 : vector<1x32xf32>
    %118 = arith.divf %116, %117 : vector<1x32xf32>
    %119 = arith.mulf %110, %92 : vector<1x32xf32>
    %120 = arith.mulf %104, %112 : vector<1x32xf32>
    %121 = arith.addf %119, %120 : vector<1x32xf32>
    %122 = math.tanh %121 : vector<1x32xf32>
    %123 = arith.mulf %118, %122 : vector<1x32xf32>
    %c3 = arith.constant 3 : index
    %c0_31 = arith.constant 0 : index
    %124 = vector.load %arg11[%c3, %c0_31] : memref<8x32xf32, #tpu.memory_space<vmem>>, vector<1x32xf32>
    tpu.vector_store %arg11[%c3, %c0_31], %123 {strides = array<i32>} : memref<8x32xf32, #tpu.memory_space<vmem>>, vector<1x32xf32>,
    %125 = vector.extract_strided_slice %5 {offsets = [4, 0], sizes = [1, 512], strides = [1, 1]} : vector<8x512xf32> to vector<1x512xf32>
    %cst_32 = arith.constant dense<0.000000e+00> : vector<1x512xf32>
    %126 = tpu.matmul %123, %6, %cst_32 {dimension_numbers = #tpu.dot_dimension_numbers<[1], [0], [0], [1], [0, 0, 1, 1], [], []>} : vector<1x32xf32>, vector<32x512xf32>, vector<1x512xf32> -> vector<1x512xf32>
    %127 = arith.addf %125, %126 : vector<1x512xf32>
    %128 = vector.extract_strided_slice %127 {offsets = [0, 0], sizes = [1, 32], strides = [1, 1]} : vector<1x512xf32> to vector<1x32xf32>
    %129 = arith.negf %128 : vector<1x32xf32>
    %130 = math.exp %129 : vector<1x32xf32>
    %cst_33 = arith.constant 1.000000e+00 : f32
    %131 = vector.broadcast %cst_33 : f32 to vector<1x32xf32>
    %132 = arith.addf %131, %130 : vector<1x32xf32>
    %133 = arith.divf %131, %132 : vector<1x32xf32>
    %134 = vector.extract_strided_slice %127 {offsets = [0, 128], sizes = [1, 32], strides = [1, 1]} : vector<1x512xf32> to vector<1x32xf32>
    %135 = arith.negf %134 : vector<1x32xf32>
    %136 = math.exp %135 : vector<1x32xf32>
    %cst_34 = arith.constant 1.000000e+00 : f32
    %137 = vector.broadcast %cst_34 : f32 to vector<1x32xf32>
    %138 = arith.addf %137, %136 : vector<1x32xf32>
    %139 = arith.divf %137, %138 : vector<1x32xf32>
    %140 = vector.extract_strided_slice %127 {offsets = [0, 256], sizes = [1, 32], strides = [1, 1]} : vector<1x512xf32> to vector<1x32xf32>
    %141 = math.tanh %140 : vector<1x32xf32>
    %142 = vector.extract_strided_slice %127 {offsets = [0, 384], sizes = [1, 32], strides = [1, 1]} : vector<1x512xf32> to vector<1x32xf32>
    %143 = arith.negf %142 : vector<1x32xf32>
    %144 = math.exp %143 : vector<1x32xf32>
    %cst_35 = arith.constant 1.000000e+00 : f32
    %145 = vector.broadcast %cst_35 : f32 to vector<1x32xf32>
    %146 = arith.addf %145, %144 : vector<1x32xf32>
    %147 = arith.divf %145, %146 : vector<1x32xf32>
    %148 = arith.mulf %139, %121 : vector<1x32xf32>
    %149 = arith.mulf %133, %141 : vector<1x32xf32>
    %150 = arith.addf %148, %149 : vector<1x32xf32>
    %151 = math.tanh %150 : vector<1x32xf32>
    %152 = arith.mulf %147, %151 : vector<1x32xf32>
    %c4 = arith.constant 4 : index
    %c0_36 = arith.constant 0 : index
    %153 = vector.load %arg11[%c4, %c0_36] : memref<8x32xf32, #tpu.memory_space<vmem>>, vector<1x32xf32>
    tpu.vector_store %arg11[%c4, %c0_36], %152 {strides = array<i32>} : memref<8x32xf32, #tpu.memory_space<vmem>>, vector<1x32xf32>,
    %154 = vector.extract_strided_slice %5 {offsets = [5, 0], sizes = [1, 512], strides = [1, 1]} : vector<8x512xf32> to vector<1x512xf32>
    %cst_37 = arith.constant dense<0.000000e+00> : vector<1x512xf32>
    %155 = tpu.matmul %152, %6, %cst_37 {dimension_numbers = #tpu.dot_dimension_numbers<[1], [0], [0], [1], [0, 0, 1, 1], [], []>} : vector<1x32xf32>, vector<32x512xf32>, vector<1x512xf32> -> vector<1x512xf32>
    %156 = arith.addf %154, %155 : vector<1x512xf32>
    %157 = vector.extract_strided_slice %156 {offsets = [0, 0], sizes = [1, 32], strides = [1, 1]} : vector<1x512xf32> to vector<1x32xf32>
    %158 = arith.negf %157 : vector<1x32xf32>
    %159 = math.exp %158 : vector<1x32xf32>
    %cst_38 = arith.constant 1.000000e+00 : f32
    %160 = vector.broadcast %cst_38 : f32 to vector<1x32xf32>
    %161 = arith.addf %160, %159 : vector<1x32xf32>
    %162 = arith.divf %160, %161 : vector<1x32xf32>
    %163 = vector.extract_strided_slice %156 {offsets = [0, 128], sizes = [1, 32], strides = [1, 1]} : vector<1x512xf32> to vector<1x32xf32>
    %164 = arith.negf %163 : vector<1x32xf32>
    %165 = math.exp %164 : vector<1x32xf32>
    %cst_39 = arith.constant 1.000000e+00 : f32
    %166 = vector.broadcast %cst_39 : f32 to vector<1x32xf32>
    %167 = arith.addf %166, %165 : vector<1x32xf32>
    %168 = arith.divf %166, %167 : vector<1x32xf32>
    %169 = vector.extract_strided_slice %156 {offsets = [0, 256], sizes = [1, 32], strides = [1, 1]} : vector<1x512xf32> to vector<1x32xf32>
    %170 = math.tanh %169 : vector<1x32xf32>
    %171 = vector.extract_strided_slice %156 {offsets = [0, 384], sizes = [1, 32], strides = [1, 1]} : vector<1x512xf32> to vector<1x32xf32>
    %172 = arith.negf %171 : vector<1x32xf32>
    %173 = math.exp %172 : vector<1x32xf32>
    %cst_40 = arith.constant 1.000000e+00 : f32
    %174 = vector.broadcast %cst_40 : f32 to vector<1x32xf32>
    %175 = arith.addf %174, %173 : vector<1x32xf32>
    %176 = arith.divf %174, %175 : vector<1x32xf32>
    %177 = arith.mulf %168, %150 : vector<1x32xf32>
    %178 = arith.mulf %162, %170 : vector<1x32xf32>
    %179 = arith.addf %177, %178 : vector<1x32xf32>
    %180 = math.tanh %179 : vector<1x32xf32>
    %181 = arith.mulf %176, %180 : vector<1x32xf32>
    %c5 = arith.constant 5 : index
    %c0_41 = arith.constant 0 : index
    %182 = vector.load %arg11[%c5, %c0_41] : memref<8x32xf32, #tpu.memory_space<vmem>>, vector<1x32xf32>
    tpu.vector_store %arg11[%c5, %c0_41], %181 {strides = array<i32>} : memref<8x32xf32, #tpu.memory_space<vmem>>, vector<1x32xf32>,
    %183 = vector.extract_strided_slice %5 {offsets = [6, 0], sizes = [1, 512], strides = [1, 1]} : vector<8x512xf32> to vector<1x512xf32>
    %cst_42 = arith.constant dense<0.000000e+00> : vector<1x512xf32>
    %184 = tpu.matmul %181, %6, %cst_42 {dimension_numbers = #tpu.dot_dimension_numbers<[1], [0], [0], [1], [0, 0, 1, 1], [], []>} : vector<1x32xf32>, vector<32x512xf32>, vector<1x512xf32> -> vector<1x512xf32>
    %185 = arith.addf %183, %184 : vector<1x512xf32>
    %186 = vector.extract_strided_slice %185 {offsets = [0, 0], sizes = [1, 32], strides = [1, 1]} : vector<1x512xf32> to vector<1x32xf32>
    %187 = arith.negf %186 : vector<1x32xf32>
    %188 = math.exp %187 : vector<1x32xf32>
    %cst_43 = arith.constant 1.000000e+00 : f32
    %189 = vector.broadcast %cst_43 : f32 to vector<1x32xf32>
    %190 = arith.addf %189, %188 : vector<1x32xf32>
    %191 = arith.divf %189, %190 : vector<1x32xf32>
    %192 = vector.extract_strided_slice %185 {offsets = [0, 128], sizes = [1, 32], strides = [1, 1]} : vector<1x512xf32> to vector<1x32xf32>
    %193 = arith.negf %192 : vector<1x32xf32>
    %194 = math.exp %193 : vector<1x32xf32>
    %cst_44 = arith.constant 1.000000e+00 : f32
    %195 = vector.broadcast %cst_44 : f32 to vector<1x32xf32>
    %196 = arith.addf %195, %194 : vector<1x32xf32>
    %197 = arith.divf %195, %196 : vector<1x32xf32>
    %198 = vector.extract_strided_slice %185 {offsets = [0, 256], sizes = [1, 32], strides = [1, 1]} : vector<1x512xf32> to vector<1x32xf32>
    %199 = math.tanh %198 : vector<1x32xf32>
    %200 = vector.extract_strided_slice %185 {offsets = [0, 384], sizes = [1, 32], strides = [1, 1]} : vector<1x512xf32> to vector<1x32xf32>
    %201 = arith.negf %200 : vector<1x32xf32>
    %202 = math.exp %201 : vector<1x32xf32>
    %cst_45 = arith.constant 1.000000e+00 : f32
    %203 = vector.broadcast %cst_45 : f32 to vector<1x32xf32>
    %204 = arith.addf %203, %202 : vector<1x32xf32>
    %205 = arith.divf %203, %204 : vector<1x32xf32>
    %206 = arith.mulf %197, %179 : vector<1x32xf32>
    %207 = arith.mulf %191, %199 : vector<1x32xf32>
    %208 = arith.addf %206, %207 : vector<1x32xf32>
    %209 = math.tanh %208 : vector<1x32xf32>
    %210 = arith.mulf %205, %209 : vector<1x32xf32>
    %c6 = arith.constant 6 : index
    %c0_46 = arith.constant 0 : index
    %211 = vector.load %arg11[%c6, %c0_46] : memref<8x32xf32, #tpu.memory_space<vmem>>, vector<1x32xf32>
    tpu.vector_store %arg11[%c6, %c0_46], %210 {strides = array<i32>} : memref<8x32xf32, #tpu.memory_space<vmem>>, vector<1x32xf32>,
    %212 = vector.extract_strided_slice %5 {offsets = [7, 0], sizes = [1, 512], strides = [1, 1]} : vector<8x512xf32> to vector<1x512xf32>
    %cst_47 = arith.constant dense<0.000000e+00> : vector<1x512xf32>
    %213 = tpu.matmul %210, %6, %cst_47 {dimension_numbers = #tpu.dot_dimension_numbers<[1], [0], [0], [1], [0, 0, 1, 1], [], []>} : vector<1x32xf32>, vector<32x512xf32>, vector<1x512xf32> -> vector<1x512xf32>
    %214 = arith.addf %212, %213 : vector<1x512xf32>
    %215 = vector.extract_strided_slice %214 {offsets = [0, 0], sizes = [1, 32], strides = [1, 1]} : vector<1x512xf32> to vector<1x32xf32>
    %216 = arith.negf %215 : vector<1x32xf32>
    %217 = math.exp %216 : vector<1x32xf32>
    %cst_48 = arith.constant 1.000000e+00 : f32
    %218 = vector.broadcast %cst_48 : f32 to vector<1x32xf32>
    %219 = arith.addf %218, %217 : vector<1x32xf32>
    %220 = arith.divf %218, %219 : vector<1x32xf32>
    %221 = vector.extract_strided_slice %214 {offsets = [0, 128], sizes = [1, 32], strides = [1, 1]} : vector<1x512xf32> to vector<1x32xf32>
    %222 = arith.negf %221 : vector<1x32xf32>
    %223 = math.exp %222 : vector<1x32xf32>
    %cst_49 = arith.constant 1.000000e+00 : f32
    %224 = vector.broadcast %cst_49 : f32 to vector<1x32xf32>
    %225 = arith.addf %224, %223 : vector<1x32xf32>
    %226 = arith.divf %224, %225 : vector<1x32xf32>
    %227 = vector.extract_strided_slice %214 {offsets = [0, 256], sizes = [1, 32], strides = [1, 1]} : vector<1x512xf32> to vector<1x32xf32>
    %228 = math.tanh %227 : vector<1x32xf32>
    %229 = vector.extract_strided_slice %214 {offsets = [0, 384], sizes = [1, 32], strides = [1, 1]} : vector<1x512xf32> to vector<1x32xf32>
    %230 = arith.negf %229 : vector<1x32xf32>
    %231 = math.exp %230 : vector<1x32xf32>
    %cst_50 = arith.constant 1.000000e+00 : f32
    %232 = vector.broadcast %cst_50 : f32 to vector<1x32xf32>
    %233 = arith.addf %232, %231 : vector<1x32xf32>
    %234 = arith.divf %232, %233 : vector<1x32xf32>
    %235 = arith.mulf %226, %208 : vector<1x32xf32>
    %236 = arith.mulf %220, %228 : vector<1x32xf32>
    %237 = arith.addf %235, %236 : vector<1x32xf32>
    %238 = math.tanh %237 : vector<1x32xf32>
    %239 = arith.mulf %234, %238 : vector<1x32xf32>
    %c7 = arith.constant 7 : index
    %c0_51 = arith.constant 0 : index
    %240 = vector.load %arg11[%c7, %c0_51] : memref<8x32xf32, #tpu.memory_space<vmem>>, vector<1x32xf32>
    tpu.vector_store %arg11[%c7, %c0_51], %239 {strides = array<i32>} : memref<8x32xf32, #tpu.memory_space<vmem>>, vector<1x32xf32>,
    %c0_52 = arith.constant 0 : index
    %c0_53 = arith.constant 0 : index
    %241 = vector.load %arg11[%c0_52, %c0_53] : memref<8x32xf32, #tpu.memory_space<vmem>>, vector<8x32xf32>
    %c0_54 = arith.constant 0 : index
    %c0_55 = arith.constant 0 : index
    %242 = vector.load %arg6[%c0_54, %c0_55] : memref<32x1xf32, #tpu.memory_space<vmem>>, vector<32x1xf32>
    %cst_56 = arith.constant dense<0.000000e+00> : vector<8x1xf32>
    %243 = tpu.matmul %241, %242, %cst_56 {dimension_numbers = #tpu.dot_dimension_numbers<[1], [0], [0], [1], [0, 0, 1, 1], [], []>} : vector<8x32xf32>, vector<32x1xf32>, vector<8x1xf32> -> vector<8x1xf32>
    %c0_57 = arith.constant 0 : index
    %c0_58 = arith.constant 0 : index
    %244 = vector.load %arg7[%c0_57, %c0_58] : memref<1x1xf32, #tpu.memory_space<vmem>>, vector<1x1xf32>
    %245 = vector.broadcast %244 : vector<1x1xf32> to vector<8x1xf32>
    %246 = arith.addf %243, %245 : vector<8x1xf32>
    %247 = arith.negf %246 : vector<8x1xf32>
    %248 = math.exp %247 : vector<8x1xf32>
    %cst_59 = arith.constant 1.000000e+00 : f32
    %249 = vector.broadcast %cst_59 : f32 to vector<8x1xf32>
    %250 = arith.addf %249, %248 : vector<8x1xf32>
    %251 = arith.divf %249, %250 : vector<8x1xf32>
    %c0_60 = arith.constant 0 : index
    %c0_61 = arith.constant 0 : index
    %252 = vector.load %arg8[%c0_60, %c0_61] : memref<8x1xf32, #tpu.memory_space<vmem>>, vector<8x1xf32>
    tpu.vector_store %arg8[%c0_60, %c0_61], %251 {strides = array<i32>} : memref<8x1xf32, #tpu.memory_space<vmem>>, vector<8x1xf32>,
    %c0_62 = arith.constant 0 : index
    %c0_63 = arith.constant 0 : index
    %253 = vector.load %arg9[%c0_62, %c0_63] : memref<1x32xf32, #tpu.memory_space<vmem>>, vector<1x32xf32>
    tpu.vector_store %arg9[%c0_62, %c0_63], %239 {strides = array<i32>} : memref<1x32xf32, #tpu.memory_space<vmem>>, vector<1x32xf32>,
    %c0_64 = arith.constant 0 : index
    %c0_65 = arith.constant 0 : index
    %254 = vector.load %arg10[%c0_64, %c0_65] : memref<1x32xf32, #tpu.memory_space<vmem>>, vector<1x32xf32>
    tpu.vector_store %arg10[%c0_64, %c0_65], %237 {strides = array<i32>} : memref<1x32xf32, #tpu.memory_space<vmem>>, vector<1x32xf32>,
    return
  }
}

</mosaic_0001>

<bundles_post_ra>
// kernel: tpu_custom_call.1
= control target key start
LH: loop header
LB: loop body
LE: loop exit
PB: predicated region body
PF: predicated region fallthrough
CT: control target
= control target key end

     0   :  { %s2620_s0 = inlined_call_operand.vmem [shape: f32[8,2], index: 0, kind: input, shape index: {}]   ;;  %s2621_s1 = inlined_call_operand.vmem [shape: f32[1,32], index: 1, kind: input, shape index: {}]   ;;  %s2622_s2 = inlined_call_operand.vmem [shape: f32[1,32], index: 2, kind: input, shape index: {}]   ;;  %s2623_s3 = inlined_call_operand.vmem [shape: f32[2,512], index: 3, kind: input, shape index: {}]   ;;  %s2624_s4 = inlined_call_operand.hbm [shape: f32[32,512], index: 4, kind: input, shape index: {}]   ;;  %s2625_s5 = inlined_call_operand.vmem [shape: f32[1,512], index: 5, kind: input, shape index: {}]   ;;  %s2626_s6 = inlined_call_operand.vmem [shape: f32[32,1], index: 6, kind: input, shape index: {}]   ;;  %s2627_s7 = inlined_call_operand.<no memory space> [shape: f32[1,1], index: 7, kind: input, shape index: {}]   ;;  %s2628_s8 = inlined_call_operand.vmem [shape: f32[8,1], index: 8, kind: output, shape index: {0}]   ;;  %s2629_s9 = inlined_call_operand.hbm [shape: f32[1,32], index: 9, kind: output, shape index: {1}]   ;;  %s2630_s10 = inlined_call_operand.hbm [shape: f32[1,32], index: 10, kind: output, shape index: {2}]  }
   0x1   :  { %v16_v0 = vstv %s2627_s7 }
   0x2   :  { %17 = vst [vmem:[#allocation3] sm:$0x1] %v16_v0 }
   0x3   :  { %18 = vsyncpa [#allocation5], 0 }
   0x4   :  { %19 = vsyncpa [#allocation6], 0 }
   0x5   :  { %20 = vsyncpa [#allocation9], 0  ;;  %s2318_s15 = smov [#allocation4]   ;;  %s2246_s19 = scalar_lea.hbm %s2624_s4, 2048 }
   0x6   :  { %s34_s16 = sshll.u32 %s2318_s15, 4  ;;  %p2247_p0 = scmp.ne.s32.totalorder %s2624_s4, %s2246_s19  ;;  %s35_s16 = int_to_ptr.vmem [resolvable:$true] %s34_s16 }
   0x7   :  { %p2250_p1 = scmp.lt.u32.totalorder %s2246_s19, %s2624_s4 }
   0x9   :  { %p2252_p2 = pnand %p2250_p1, %p2247_p0 }
   0xb   :  { %2255 = shalt.err (!%p2252_p2)
}
   0xc   :  { %s2256_s7 = scalar_lea.vmem %s35_s16, 2048  ;;  %p2261_p4 = scmp.lt.s32.totalorder %s35_s16, %s35_s16 }
   0xd   :  { %p2257_p3 = scmp.ne.s32.totalorder %s35_s16, %s2256_s7  ;;  %p2262_p5 = scmp.lt.s32.totalorder %s2256_s7, %s2256_s7 }
   0xf   :  { %p2263_p6 = por %p2262_p5, %p2261_p4 }
  0x11   :  { %p2264_p7 = pnand %p2263_p6, %p2257_p3 }
  0x13   :  { %2267 = shalt.err (!%p2264_p7)
}
  0x14   :  { %s2319_s24 = smov 512   ;;  %s2320_s25 = smov 32  }
  0x15   :  { %40 = dma.hbm_to_vmem [thread:$0]  %s2624_s4, 2048, %s35_s16, [#allocation5], %s2319_s24, %s2319_s24, %s2320_s25  }
  0x16   :  { %2312 = dma.done.wait [#allocation5], 2048  }
  0x17   :  { %2313 = vsyncadd [#allocation5], 4294965248  ;;  %v54_v1 = vlaneseq  ;;  %v2321_v2 = vmov 1983009808   ;;  %v2322_v4 = vmov 0.0   ;;  %v248_v8 = vld [vmem:[#allocation4 + $0x8] sm:$0xff] }
  0x18   :  { %v77_v3 = vunpack.c.l.s4 %v2321_v2  ;;  %169 = vmatprep.mubr.f32.mxu1 %v2322_v4  ;;  %333 = vmatprep.mubr.f32.mxu0 %v2322_v4  ;;  %v252_v9 = vld [vmem:[#allocation4 + $0x28] sm:$0xff]  ;;  %v247_v10 = vld [vmem:[#allocation4] sm:$0xff]  ;;  %v51_v13 = vld [vmem:[%s2623_s3] sm:$0xff]  ;;  %vm96_vm0 = vcmask 1041408   ;;  %vm92_vm1 = vcmask 15360   ;;  %vm265_vm2 = vcmask 261120  }
  0x19   :  { %v2399_v5 = vshrl.u32 %v54_v1, 7  ;;  %v2402_v11 = vpack.c.bf16 %v252_v9, %v248_v8  ;;  %v251_v12 = vld [vmem:[#allocation4 + $0x20] sm:$0xff]  ;;  %v256_v14 = vld [vmem:[#allocation4 + $0x48] sm:$0xff]  ;;  %v75_v16 = vcombine.high %v51_v13, %v51_v13  ;;  %v250_v25 = vld [vmem:[#allocation4 + $0x18] sm:$0xff]  ;;  %vm439_vm3 = vcmask 253952   ;;  %s2326_s21 = smov [#allocation8]  }
  0x1a   :  { %v78_v6 = vunpack.c.0.s8 %v77_v3  ;;  %v2407_v15 = vpack.c.bf16 %v251_v12, %v247_v10  ;;  %v260_v18 = vld [vmem:[#allocation4 + $0x68] sm:$0xff]  ;;  %v255_v19 = vld [vmem:[#allocation4 + $0x40] sm:$0xff]  ;;  %v254_v26 = vld [vmem:[#allocation4 + $0x38] sm:$0xff]  ;;  %vm629_vm4 = vcmask 254977   ;;  %vm820_vm5 = vcmask 256002   ;;  %s1890_s22 = sshll.u32 %s2326_s21, 4  ;;  %s1891_s22 = int_to_ptr.vmem [resolvable:$true] %s1890_s22 }
  0x1b   :  { %1971 = vmatprep.subr.bf16.mxu0 %v2402_v11  ;;  %v2410_v20 = vpack.c.bf16 %v260_v18, %v256_v14  ;;  %v259_v21 = vld [vmem:[#allocation4 + $0x60] sm:$0xff]  ;;  %v50_v27 = vld [vmem:[%s2620_s0] sm:$0xff]  ;;  %v2421_v31 = vpack.c.bf16 %v254_v26, %v250_v25  ;;  %v56_v40 = vsub.s32 0, %v2399_v5  ;;  %v60_v42 = vsub.s32 1, %v2399_v5 }
  0x1c   :  { %v81_v7 = vsub.s32 %v78_v6, %v2399_v5  ;;  %1973 = vmatpush1.bf16.msra.mxu0 %v2407_v15  ;;  %v2413_v24 = vpack.c.bf16 %v259_v21, %v255_v19  ;;  %v249_v29 = vld [vmem:[#allocation4 + $0x10] sm:$0xff]  ;;  %v258_v32 = vld [vmem:[#allocation4 + $0x58] sm:$0xff]  ;;  %v68_v49 = vsub.s32 3, %v2399_v5  ;;  %v64_v53 = vsub.s32 2, %v2399_v5 }
  0x1d   :  { %1975 = vmatprep.subr.bf16.mxu0 %v2410_v20  ;;  %v253_v30 = vld [vmem:[#allocation4 + $0x30] sm:$0xff]  ;;  %v262_v33 = vld [vmem:[#allocation4 + $0x78] sm:$0xff]  ;;  %vm1011_vm6 = vcmask 257027   ;;  %vm1202_vm7 = vcmask 258052   ;;  %vm1393_vm8 = vcmask 259077   ;;  %vm1584_vm9 = vcmask 260102  }
  0x1e   :  { %v82_v17 = vrot.slane %v51_v13, %v81_v7  ;;  %v89_v22 = vrot.slane %v75_v16, %v81_v7  ;;  %v263_v34 = vld [vmem:[%s2621_s1] sm:$0x1]  ;;  %v2430_v35 = vpack.c.bf16 %v253_v30, %v249_v29  ;;  %v2433_v36 = vpack.c.bf16 %v262_v33, %v258_v32 }
  0x1f   :  { %v257_v37 = vld [vmem:[#allocation4 + $0x50] sm:$0xff]  ;;  %vm2324_vm10 = vmmov 0   ;;  %vm1775_vm11 = vcmask 261127  }
  0x20   :  { %v90_v23 = vcombine.high %v82_v17, %v82_v17  ;;  %v91_v28 = vcombine.high %v89_v22, %v89_v22  ;;  %1977 = vmatpush1.bf16.msra.mxu0 %v2413_v24  ;;  %v261_v38 = vld [vmem:[#allocation4 + $0x70] sm:$0xff] }
  0x21   :  { %1987 = vmatprep.subr.bf16.mxu0 %v2402_v11  ;;  %v2441_v39 = vpack.c.bf16 %v261_v38, %v257_v37  ;;  %v52_v41 = vld [vmem:[%s2625_s5] sm:$0xf] }
  0x22   :  { %1905 = vmatprep.subr.msk.mxu1 %vm96_vm0, %v90_v23  ;;  %v57_v43 = vrot.slane %v52_v41, %v56_v40  ;;  %v61_v44 = vrot.slane %v52_v41, %v60_v42  ;;  %v69_v58 = vrot.slane %v52_v41, %v68_v49  ;;  %v65_v60 = vrot.slane %v52_v41, %v64_v53  ;;  %v264_v12 = vld [vmem:[%s2622_s2] sm:$0x1] }
  0x23   :  { %1906 = vmatpush1.msk.msra.mxu1 %vm96_vm0, %v82_v17  ;;  %1911 = vmatmul.mubr.msk.f32.vlgmr.msra.gmra.mrb[0].mxu0 %vm265_vm2, %v263_v34 }
  0x24   :  { %1907 = vmatmul.mubr.msk.f32.vlgmr.msra.gmra.mrb[0].mxu1 %vm92_vm1, %v50_v27  ;;  %1908 = vmatprep.subr.msk.mxu1 %vm96_vm0, %v91_v28 }
  0x25   :  { %240 = vmatprep.mubr.f32.mxu1 %v2322_v4  ;;  %1909 = vmatpush1.msk.msra.mxu1 %vm96_vm0, %v89_v22 }
  0x26   :  { %1979 = vmatprep.subr.bf16.mxu1 %v2421_v31  ;;  %1989 = vmatpush1.bf16.msra.mxu0 %v2407_v15 }
  0x27   :  { %1991 = vmatprep.subr.bf16.mxu0 %v2410_v20  ;;  %508 = vmatprep.mubr.f32.mxu0 %v2322_v4 }
  0x28   :  { %1910 = vmatmul.mubr.msk.f32.vlgmr.msra.gmra.mrb[2].mxu1 %vm92_vm1, %v50_v27 }
  0x29   :  { %1981 = vmatpush1.bf16.msra.mxu1 %v2430_v35  ;;  %404 = vmatprep.mubr.f32.mxu1 %v2322_v4 }
  0x2a   :  { %1983 = vmatprep.subr.bf16.mxu1 %v2433_v36  ;;  %1993 = vmatpush1.bf16.msra.mxu0 %v2413_v24 }
  0x2b   :  { %2003 = vmatprep.subr.bf16.mxu0 %v2402_v11 }
  0x2d   :  { %1985 = vmatpush1.bf16.msra.mxu1 %v2441_v39 }
  0x2e   :  { %1995 = vmatprep.subr.bf16.mxu1 %v2421_v31 }
  0x30   :  { %1912 = vmatmul.mubr.msk.f32.vlgmr.msra.gmra.mrb[4].mxu1 %vm265_vm2, %v263_v34 }
  0x31   :  { %1997 = vmatpush1.bf16.msra.mxu1 %v2430_v35  ;;  %579 = vmatprep.mubr.f32.mxu1 %v2322_v4 }
  0x32   :  { %1999 = vmatprep.subr.bf16.mxu1 %v2433_v36 }
  0x35   :  { %2001 = vmatpush1.bf16.msra.mxu1 %v2441_v39 }
  0x36   :  { %2011 = vmatprep.subr.bf16.mxu1 %v2421_v31 }
  0xf6   :  { %v335_v50 = vpop.f32.mrb[0].mxu0 }
  0xf7   :  { %v171_v45 = vpop.f32.mrb[0].mxu1  ;;  %v337_v52 = vpop.f32.mrb[1].mxu0 }
  0xf8   :  { %v2462_v46 = vadd.f32 %v171_v45, %v57_v43  ;;  %v173_v47 = vpop.f32.mrb[1].mxu1 }
  0xf9   :  { %v2464_v48 = vadd.f32 %v173_v47, %v61_v44 }
  0xfa   :  { %v411_v51 = vadd.f32 %v335_v50, %v2462_v46 }
  0xfb   :  { %v242_v54 = vpop.f32.mrb[2].mxu1  ;;  %v412_v55 = vadd.f32 %v337_v52, %v2464_v48 }
  0xfc   :  { %v244_v56 = vpop.f32.mrb[3].mxu1  ;;  %v1913_v57 = vmul.f32 -1.442695, %v411_v51  ;;  %v2472_v62 = vadd.f32 %v242_v54, %v65_v60 }
  0xfd   :  { %v1914_v59 = vmul.f32 -1.442695, %v412_v55  ;;  %v2470_v61 = vadd.f32 %v244_v56, %v69_v58 }
  0xfe   :  { %2114 = vpow2.f32 %v1913_v57 }
  0xff   :  { %2116 = vpow2.f32 %v1914_v59 }
 0x103   :  { %v406_v63 = vpop.f32.mrb[4].mxu1 }
 0x104   :  { %v408_v0 = vpop.f32.mrb[5].mxu1  ;;  %v413_v2 = vadd.f32 %v406_v63, %v2472_v62 }
 0x105   :  { %v414_v1 = vadd.f32 %v408_v0, %v2470_v61 }
 0x107   :  { %v1915_v3 = vmul.f32 -1.442695, %v414_v1 }
 0x108   :  { %v2115_v5 = vpop.eup %2114 }
 0x109   :  { %v2117_v6 = vpop.eup %2116  ;;  %v418_v7 = vadd.f32 1.0, %v2115_v5  ;;  %2118 = vpow2.f32 %v1915_v3 }
 0x10a   :  { %v424_v8 = vadd.f32 1.0, %v2117_v6  ;;  %2120 = vtanh.f32 %v413_v2 }
 0x10b   :  { %2122 = vrcp.f32 %v418_v7 }
 0x10c   :  { %2124 = vrcp.f32 %v424_v8 }
 0x113   :  { %v2119_v9 = vpop.eup %2118 }
 0x114   :  { %v2121_v10 = vpop.eup %2120  ;;  %v431_v17 = vadd.f32 1.0, %v2119_v9 }
 0x115   :  { %v2123_v13 = vpop.eup %2122 }
 0x116   :  { %v2125_v14 = vpop.eup %2124  ;;  %v435_v16 = vmul.f32 %v2123_v13, %v2121_v10  ;;  %2126 = vrcp.f32 %v431_v17 }
 0x117   :  { %v434_v18 = vmul.f32 %v2125_v14, %v264_v12 }
 0x119   :  { %v436_v19 = vadd.f32 %v435_v16, %v434_v18 }
 0x11b   :  { %2128 = vtanh.f32 %v436_v19  ;;  %v622_v53 = vrot.slane %v436_v19, 7 }
 0x120   :  { %v2127_v21 = vpop.eup %2126 }
 0x125   :  { %v2129_v22 = vpop.eup %2128 }
 0x126   :  { %v438_v23 = vmul.f32 %v2129_v22, %v2127_v21 }
 0x128   :  { %440 = vst.msk [vmem:[#allocation2] sm:$0x1] %vm439_vm3, %v438_v23  ;;  %1916 = vmatmul.mubr.msk.f32.vlgmr.msra.gmra.mrb[2].mxu0 %vm265_vm2, %v438_v23  ;;  %1917 = vmatmul.mubr.msk.f32.vlgmr.msra.gmra.mrb[6].mxu1 %vm265_vm2, %v438_v23 }
 0x129   :  { %2005 = vmatpush1.bf16.msra.mxu0 %v2407_v15  ;;  %2013 = vmatpush1.bf16.msra.mxu1 %v2430_v35 }
 0x12a   :  { %2007 = vmatprep.subr.bf16.mxu0 %v2410_v20  ;;  %2015 = vmatprep.subr.bf16.mxu1 %v2433_v36 }
 0x12b   :  { %699 = vmatprep.mubr.f32.mxu0 %v2322_v4  ;;  %770 = vmatprep.mubr.f32.mxu1 %v2322_v4 }
 0x12d   :  { %2009 = vmatpush1.bf16.msra.mxu0 %v2413_v24  ;;  %2017 = vmatpush1.bf16.msra.mxu1 %v2441_v39 }
 0x12e   :  { %2019 = vmatprep.subr.bf16.mxu0 %v2402_v11  ;;  %2027 = vmatprep.subr.bf16.mxu1 %v2421_v31 }
 0x1fb   :  { %v510_v25 = vpop.f32.mrb[2].mxu0  ;;  %v581_v26 = vpop.f32.mrb[6].mxu1 }
 0x1fc   :  { %v590_v27 = vrot.slane %v510_v25, 7  ;;  %v512_v28 = vpop.f32.mrb[3].mxu0  ;;  %v583_v29 = vpop.f32.mrb[7].mxu1  ;;  %v592_v41 = vrot.slane %v581_v26, 7 }
 0x1fd   :  { %v591_v30 = vrot.slane %v512_v28, 7  ;;  %v593_v38 = vrot.slane %v583_v29, 7 }
 0x1fe   :  { %v598_v32 = vadd.f32 %v590_v27, %v2462_v46  ;;  %v600_v43 = vadd.f32 %v592_v41, %v2472_v62 }
 0x1ff   :  { %v599_v33 = vadd.f32 %v591_v30, %v2464_v48  ;;  %v601_v40 = vadd.f32 %v593_v38, %v2470_v61 }
 0x200   :  { %v1918_v34 = vmul.f32 -1.442695, %v598_v32 }
 0x201   :  { %v1919_v37 = vmul.f32 -1.442695, %v599_v33  ;;  %v1920_v42 = vmul.f32 -1.442695, %v601_v40 }
 0x202   :  { %2130 = vpow2.f32 %v1918_v34 }
 0x203   :  { %2132 = vpow2.f32 %v1919_v37 }
 0x204   :  { %2134 = vpow2.f32 %v1920_v42 }
 0x205   :  { %2136 = vtanh.f32 %v600_v43 }
 0x20c   :  { %v2131_v44 = vpop.eup %2130 }
 0x20d   :  { %v2133_v45 = vpop.eup %2132  ;;  %v605_v47 = vadd.f32 1.0, %v2131_v44 }
 0x20e   :  { %v611_v49 = vadd.f32 1.0, %v2133_v45  ;;  %v2135_v50 = vpop.eup %2134 }
 0x20f   :  { %2138 = vrcp.f32 %v605_v47  ;;  %v2137_v51 = vpop.eup %2136  ;;  %v618_v56 = vadd.f32 1.0, %v2135_v50 }
 0x210   :  { %2140 = vrcp.f32 %v611_v49 }
 0x211   :  { %2142 = vrcp.f32 %v618_v56 }
 0x219   :  { %v2139_v52 = vpop.eup %2138 }
 0x21a   :  { %v2141_v54 = vpop.eup %2140  ;;  %v625_v55 = vmul.f32 %v2139_v52, %v2137_v51 }
 0x21b   :  { %v624_v57 = vmul.f32 %v2141_v54, %v622_v53  ;;  %v2143_v59 = vpop.eup %2142 }
 0x21d   :  { %v626_v58 = vadd.f32 %v625_v55, %v624_v57 }
 0x21f   :  { %2144 = vtanh.f32 %v626_v58  ;;  %v813_v28 = vrot.slane %v626_v58, 7 }
 0x229   :  { %v2145_v60 = vpop.eup %2144 }
 0x22a   :  { %v628_v63 = vmul.f32 %v2145_v60, %v2143_v59 }
 0x22c   :  { %630 = vst.msk [vmem:[#allocation2] sm:$0x2] %vm629_vm4, %v628_v63  ;;  %v632_v0 = vrot.slane %v628_v63, 1 }
 0x22e   :  { %1921 = vmatmul.mubr.msk.f32.vlgmr.msra.gmra.mrb[4].mxu0 %vm265_vm2, %v632_v0  ;;  %1922 = vmatmul.mubr.msk.f32.vlgmr.msra.gmra.mrb[8].mxu1 %vm265_vm2, %v632_v0 }
 0x22f   :  { %2021 = vmatpush1.bf16.msra.mxu0 %v2407_v15  ;;  %2029 = vmatpush1.bf16.msra.mxu1 %v2430_v35 }
 0x230   :  { %2023 = vmatprep.subr.bf16.mxu0 %v2410_v20  ;;  %2031 = vmatprep.subr.bf16.mxu1 %v2433_v36 }
 0x231   :  { %890 = vmatprep.mubr.f32.mxu0 %v2322_v4  ;;  %961 = vmatprep.mubr.f32.mxu1 %v2322_v4 }
 0x233   :  { %2025 = vmatpush1.bf16.msra.mxu0 %v2413_v24  ;;  %2033 = vmatpush1.bf16.msra.mxu1 %v2441_v39 }
 0x234   :  { %2035 = vmatprep.subr.bf16.mxu0 %v2402_v11  ;;  %2043 = vmatprep.subr.bf16.mxu1 %v2421_v31 }
 0x301   :  { %v701_v1 = vpop.f32.mrb[4].mxu0  ;;  %v772_v2 = vpop.f32.mrb[8].mxu1 }
 0x302   :  { %v781_v3 = vrot.slane %v701_v1, 6  ;;  %v703_v5 = vpop.f32.mrb[5].mxu0  ;;  %v774_v6 = vpop.f32.mrb[9].mxu1  ;;  %v783_v16 = vrot.slane %v772_v2, 6 }
 0x303   :  { %v782_v7 = vrot.slane %v703_v5, 6  ;;  %v784_v13 = vrot.slane %v774_v6, 6 }
 0x304   :  { %v789_v8 = vadd.f32 %v781_v3, %v2462_v46  ;;  %v791_v18 = vadd.f32 %v783_v16, %v2472_v62 }
 0x305   :  { %v790_v9 = vadd.f32 %v782_v7, %v2464_v48  ;;  %v792_v14 = vadd.f32 %v784_v13, %v2470_v61 }
 0x306   :  { %v1923_v10 = vmul.f32 -1.442695, %v789_v8 }
 0x307   :  { %v1924_v12 = vmul.f32 -1.442695, %v790_v9  ;;  %v1925_v17 = vmul.f32 -1.442695, %v792_v14 }
 0x308   :  { %2146 = vpow2.f32 %v1923_v10 }
 0x309   :  { %2148 = vpow2.f32 %v1924_v12 }
 0x30a   :  { %2150 = vpow2.f32 %v1925_v17 }
 0x30b   :  { %2152 = vtanh.f32 %v791_v18 }
 0x312   :  { %v2147_v19 = vpop.eup %2146 }
 0x313   :  { %v2149_v21 = vpop.eup %2148  ;;  %v796_v22 = vadd.f32 1.0, %v2147_v19 }
 0x314   :  { %v802_v23 = vadd.f32 1.0, %v2149_v21  ;;  %v2151_v25 = vpop.eup %2150 }
 0x315   :  { %2154 = vrcp.f32 %v796_v22  ;;  %v2153_v26 = vpop.eup %2152  ;;  %v809_v32 = vadd.f32 1.0, %v2151_v25 }
 0x316   :  { %2156 = vrcp.f32 %v802_v23 }
 0x317   :  { %2158 = vrcp.f32 %v809_v32 }
 0x31f   :  { %v2155_v27 = vpop.eup %2154 }
 0x320   :  { %v2157_v29 = vpop.eup %2156  ;;  %v816_v30 = vmul.f32 %v2155_v27, %v2153_v26 }
 0x321   :  { %v815_v33 = vmul.f32 %v2157_v29, %v813_v28  ;;  %v2159_v37 = vpop.eup %2158 }
 0x323   :  { %v817_v34 = vadd.f32 %v816_v30, %v815_v33 }
 0x325   :  { %2160 = vtanh.f32 %v817_v34  ;;  %v1004_v5 = vrot.slane %v817_v34, 7 }
 0x32f   :  { %v2161_v38 = vpop.eup %2160 }
 0x330   :  { %v819_v40 = vmul.f32 %v2161_v38, %v2159_v37 }
 0x332   :  { %821 = vst.msk [vmem:[#allocation2] sm:$0x4] %vm820_vm5, %v819_v40  ;;  %v823_v41 = vrot.slane %v819_v40, 2 }
 0x334   :  { %1926 = vmatmul.mubr.msk.f32.vlgmr.msra.gmra.mrb[6].mxu0 %vm265_vm2, %v823_v41  ;;  %1927 = vmatmul.mubr.msk.f32.vlgmr.msra.gmra.mrb[10].mxu1 %vm265_vm2, %v823_v41 }
 0x335   :  { %2037 = vmatpush1.bf16.msra.mxu0 %v2407_v15  ;;  %2045 = vmatpush1.bf16.msra.mxu1 %v2430_v35 }
 0x336   :  { %2039 = vmatprep.subr.bf16.mxu0 %v2410_v20  ;;  %2047 = vmatprep.subr.bf16.mxu1 %v2433_v36 }
 0x337   :  { %1081 = vmatprep.mubr.f32.mxu0 %v2322_v4  ;;  %1152 = vmatprep.mubr.f32.mxu1 %v2322_v4 }
 0x339   :  { %2041 = vmatpush1.bf16.msra.mxu0 %v2413_v24  ;;  %2049 = vmatpush1.bf16.msra.mxu1 %v2441_v39 }
 0x33a   :  { %2051 = vmatprep.subr.bf16.mxu0 %v2402_v11  ;;  %2059 = vmatprep.subr.bf16.mxu1 %v2421_v31 }
 0x407   :  { %v892_v42 = vpop.f32.mrb[6].mxu0  ;;  %v963_v43 = vpop.f32.mrb[10].mxu1 }
 0x408   :  { %v972_v44 = vrot.slane %v892_v42, 5  ;;  %v894_v45 = vpop.f32.mrb[7].mxu0  ;;  %v965_v47 = vpop.f32.mrb[11].mxu1  ;;  %v974_v56 = vrot.slane %v963_v43, 5 }
 0x409   :  { %v973_v49 = vrot.slane %v894_v45, 5  ;;  %v975_v54 = vrot.slane %v965_v47, 5 }
 0x40a   :  { %v980_v50 = vadd.f32 %v972_v44, %v2462_v46  ;;  %v982_v58 = vadd.f32 %v974_v56, %v2472_v62 }
 0x40b   :  { %v981_v51 = vadd.f32 %v973_v49, %v2464_v48  ;;  %v983_v55 = vadd.f32 %v975_v54, %v2470_v61 }
 0x40c   :  { %v1928_v52 = vmul.f32 -1.442695, %v980_v50 }
 0x40d   :  { %v1929_v53 = vmul.f32 -1.442695, %v981_v51  ;;  %v1930_v57 = vmul.f32 -1.442695, %v983_v55 }
 0x40e   :  { %2162 = vpow2.f32 %v1928_v52 }
 0x40f   :  { %2164 = vpow2.f32 %v1929_v53 }
 0x410   :  { %2166 = vpow2.f32 %v1930_v57 }
 0x411   :  { %2168 = vtanh.f32 %v982_v58 }
 0x418   :  { %v2163_v59 = vpop.eup %2162 }
 0x419   :  { %v2165_v60 = vpop.eup %2164  ;;  %v987_v63 = vadd.f32 1.0, %v2163_v59 }
 0x41a   :  { %v993_v0 = vadd.f32 1.0, %v2165_v60  ;;  %v2167_v1 = vpop.eup %2166 }
 0x41b   :  { %2170 = vrcp.f32 %v987_v63  ;;  %v2169_v2 = vpop.eup %2168  ;;  %v1000_v8 = vadd.f32 1.0, %v2167_v1 }
 0x41c   :  { %2172 = vrcp.f32 %v993_v0 }
 0x41d   :  { %2174 = vrcp.f32 %v1000_v8 }
 0x425   :  { %v2171_v3 = vpop.eup %2170 }
 0x426   :  { %v2173_v6 = vpop.eup %2172  ;;  %v1007_v7 = vmul.f32 %v2171_v3, %v2169_v2 }
 0x427   :  { %v1006_v9 = vmul.f32 %v2173_v6, %v1004_v5  ;;  %v2175_v12 = vpop.eup %2174 }
 0x429   :  { %v1008_v10 = vadd.f32 %v1007_v7, %v1006_v9 }
 0x42b   :  { %2176 = vtanh.f32 %v1008_v10  ;;  %v1195_v45 = vrot.slane %v1008_v10, 7 }
 0x435   :  { %v2177_v13 = vpop.eup %2176 }
 0x436   :  { %v1010_v14 = vmul.f32 %v2177_v13, %v2175_v12 }
 0x438   :  { %1012 = vst.msk [vmem:[#allocation2] sm:$0x8] %vm1011_vm6, %v1010_v14  ;;  %v1014_v16 = vrot.slane %v1010_v14, 3 }
 0x43a   :  { %1931 = vmatmul.mubr.msk.f32.vlgmr.msra.gmra.mrb[8].mxu0 %vm265_vm2, %v1014_v16  ;;  %1932 = vmatmul.mubr.msk.f32.vlgmr.msra.gmra.mrb[12].mxu1 %vm265_vm2, %v1014_v16 }
 0x43b   :  { %2053 = vmatpush1.bf16.msra.mxu0 %v2407_v15  ;;  %2061 = vmatpush1.bf16.msra.mxu1 %v2430_v35 }
 0x43c   :  { %2055 = vmatprep.subr.bf16.mxu0 %v2410_v20  ;;  %2063 = vmatprep.subr.bf16.mxu1 %v2433_v36 }
 0x43d   :  { %1272 = vmatprep.mubr.f32.mxu0 %v2322_v4  ;;  %1343 = vmatprep.mubr.f32.mxu1 %v2322_v4 }
 0x43f   :  { %2057 = vmatpush1.bf16.msra.mxu0 %v2413_v24  ;;  %2065 = vmatpush1.bf16.msra.mxu1 %v2441_v39 }
 0x440   :  { %2067 = vmatprep.subr.bf16.mxu0 %v2402_v11  ;;  %2075 = vmatprep.subr.bf16.mxu1 %v2421_v31 }
 0x50d   :  { %v1083_v17 = vpop.f32.mrb[8].mxu0  ;;  %v1154_v18 = vpop.f32.mrb[12].mxu1 }
 0x50e   :  { %v1163_v19 = vrot.slane %v1083_v17, 4  ;;  %v1085_v21 = vpop.f32.mrb[9].mxu0  ;;  %v1156_v22 = vpop.f32.mrb[13].mxu1  ;;  %v1165_v32 = vrot.slane %v1154_v18, 4 }
 0x50f   :  { %v1164_v23 = vrot.slane %v1085_v21, 4  ;;  %v1166_v29 = vrot.slane %v1156_v22, 4 }
 0x510   :  { %v1171_v25 = vadd.f32 %v1163_v19, %v2462_v46  ;;  %v1173_v34 = vadd.f32 %v1165_v32, %v2472_v62 }
 0x511   :  { %v1172_v26 = vadd.f32 %v1164_v23, %v2464_v48  ;;  %v1174_v30 = vadd.f32 %v1166_v29, %v2470_v61 }
 0x512   :  { %v1933_v27 = vmul.f32 -1.442695, %v1171_v25 }
 0x513   :  { %v1934_v28 = vmul.f32 -1.442695, %v1172_v26  ;;  %v1935_v33 = vmul.f32 -1.442695, %v1174_v30 }
 0x514   :  { %2178 = vpow2.f32 %v1933_v27 }
 0x515   :  { %2180 = vpow2.f32 %v1934_v28 }
 0x516   :  { %2182 = vpow2.f32 %v1935_v33 }
 0x517   :  { %2184 = vtanh.f32 %v1173_v34 }
 0x51e   :  { %v2179_v37 = vpop.eup %2178 }
 0x51f   :  { %v2181_v38 = vpop.eup %2180  ;;  %v1178_v40 = vadd.f32 1.0, %v2179_v37 }
 0x520   :  { %v1184_v41 = vadd.f32 1.0, %v2181_v38  ;;  %v2183_v42 = vpop.eup %2182 }
 0x521   :  { %2186 = vrcp.f32 %v1178_v40  ;;  %v2185_v43 = vpop.eup %2184  ;;  %v1191_v50 = vadd.f32 1.0, %v2183_v42 }
 0x522   :  { %2188 = vrcp.f32 %v1184_v41 }
 0x523   :  { %2190 = vrcp.f32 %v1191_v50 }
 0x52b   :  { %v2187_v44 = vpop.eup %2186 }
 0x52c   :  { %v2189_v47 = vpop.eup %2188  ;;  %v1198_v49 = vmul.f32 %v2187_v44, %v2185_v43 }
 0x52d   :  { %v1197_v51 = vmul.f32 %v2189_v47, %v1195_v45  ;;  %v2191_v53 = vpop.eup %2190 }
 0x52f   :  { %v1199_v52 = vadd.f32 %v1198_v49, %v1197_v51 }
 0x531   :  { %2192 = vtanh.f32 %v1199_v52  ;;  %v1386_v18 = vrot.slane %v1199_v52, 7 }
 0x53b   :  { %v2193_v54 = vpop.eup %2192 }
 0x53c   :  { %v1201_v55 = vmul.f32 %v2193_v54, %v2191_v53 }
 0x53e   :  { %1203 = vst.msk [vmem:[#allocation2] sm:$0x10] %vm1202_vm7, %v1201_v55  ;;  %v1205_v56 = vrot.slane %v1201_v55, 4 }
 0x540   :  { %1936 = vmatmul.mubr.msk.f32.vlgmr.msra.gmra.mrb[10].mxu0 %vm265_vm2, %v1205_v56  ;;  %1937 = vmatmul.mubr.msk.f32.vlgmr.msra.gmra.mrb[14].mxu1 %vm265_vm2, %v1205_v56 }
 0x541   :  { %2069 = vmatpush1.bf16.msra.mxu0 %v2407_v15  ;;  %2077 = vmatpush1.bf16.msra.mxu1 %v2430_v35 }
 0x542   :  { %2071 = vmatprep.subr.bf16.mxu0 %v2410_v20  ;;  %2079 = vmatprep.subr.bf16.mxu1 %v2433_v36 }
 0x543   :  { %1463 = vmatprep.mubr.f32.mxu0 %v2322_v4  ;;  %1534 = vmatprep.mubr.f32.mxu1 %v2322_v4 }
 0x545   :  { %2073 = vmatpush1.bf16.msra.mxu0 %v2413_v24  ;;  %2081 = vmatpush1.bf16.msra.mxu1 %v2441_v39 }
 0x546   :  { %2083 = vmatprep.subr.bf16.mxu0 %v2402_v11  ;;  %2091 = vmatprep.subr.bf16.mxu1 %v2421_v31 }
 0x613   :  { %v1274_v57 = vpop.f32.mrb[10].mxu0  ;;  %v1345_v58 = vpop.f32.mrb[14].mxu1 }
 0x614   :  { %v1354_v59 = vrot.slane %v1274_v57, 3  ;;  %v1276_v60 = vpop.f32.mrb[11].mxu0  ;;  %v1347_v63 = vpop.f32.mrb[15].mxu1  ;;  %v1356_v11 = vrot.slane %v1345_v58, 3 }
 0x615   :  { %v1355_v0 = vrot.slane %v1276_v60, 3  ;;  %v1357_v6 = vrot.slane %v1347_v63, 3 }
 0x616   :  { %v1362_v1 = vadd.f32 %v1354_v59, %v2462_v46  ;;  %v1364_v31 = vadd.f32 %v1356_v11, %v2472_v62 }
 0x617   :  { %v1363_v2 = vadd.f32 %v1355_v0, %v2464_v48  ;;  %v1365_v7 = vadd.f32 %v1357_v6, %v2470_v61  ;;  %v1778_v0 = vld [vmem:[%s2626_s6] sm:$0xff]  ;;  %v2323_v6 = vmov 0.0|0.0  }
 0x618   :  { %v1938_v3 = vmul.f32 -1.442695, %v1362_v1  ;;  %v1779_v1 = vld [vmem:[%s2626_s6 + $0x8] sm:$0xff] }
 0x619   :  { %v1939_v5 = vmul.f32 -1.442695, %v1363_v2  ;;  %v1940_v8 = vmul.f32 -1.442695, %v1365_v7  ;;  %v2099_v2 = vpack.c.bf16 %v1779_v1, %v1778_v0 }
 0x61a   :  { %2194 = vpow2.f32 %v1938_v3  ;;  %v1780_v3 = vld [vmem:[%s2626_s6 + $0x10] sm:$0xff] }
 0x61b   :  { %2196 = vpow2.f32 %v1939_v5  ;;  %v1781_v5 = vld [vmem:[%s2626_s6 + $0x18] sm:$0xff]  ;;  %s2325_s6 = smov [#allocation7]  }
 0x61c   :  { %2198 = vpow2.f32 %v1940_v8  ;;  %v2102_v7 = vpack.c.bf16 %v1781_v5, %v1780_v3  ;;  %s1880_s20 = sshll.u32 %s2325_s6, 4  ;;  %s1881_s20 = int_to_ptr.vmem [resolvable:$true] %s1880_s20 }
 0x61d   :  { %2200 = vtanh.f32 %v1364_v31  ;;  %s2268_s23 = scalar_lea.vmem %s1881_s20, 16  ;;  %s2272_s7 = scalar_lea.vmem %s1881_s20, 32 }
 0x61e   :  { %p2269_p8 = scmp.ne.s32.totalorder %s1881_s20, %s2268_s23  ;;  %p2273_p9 = scmp.lt.s32.totalorder %s1881_s20, %s1881_s20 }
 0x61f   :  { %p2274_p10 = scmp.lt.s32.totalorder %s2272_s7, %s2268_s23 }
 0x621   :  { %p2275_p11 = por %p2274_p10, %p2273_p9 }
 0x623   :  { %p2276_p12 = pnand %p2275_p11, %p2269_p8 }
 0x624   :  { %v2195_v9 = vpop.eup %2194 }
 0x625   :  { %v2197_v10 = vpop.eup %2196  ;;  %v1369_v12 = vadd.f32 1.0, %v2195_v9 }
 0x626   :  { %v1375_v13 = vadd.f32 1.0, %v2197_v10  ;;  %v2199_v14 = vpop.eup %2198 }
 0x627   :  { %2202 = vrcp.f32 %v1369_v12  ;;  %v2201_v16 = vpop.eup %2200  ;;  %v1382_v22 = vadd.f32 1.0, %v2199_v14 }
 0x628   :  { %2204 = vrcp.f32 %v1375_v13 }
 0x629   :  { %2206 = vrcp.f32 %v1382_v22 }
 0x631   :  { %v2203_v17 = vpop.eup %2202 }
 0x632   :  { %v2205_v19 = vpop.eup %2204  ;;  %v1389_v21 = vmul.f32 %v2203_v17, %v2201_v16 }
 0x633   :  { %v1388_v23 = vmul.f32 %v2205_v19, %v1386_v18  ;;  %v2207_v26 = vpop.eup %2206 }
 0x635   :  { %v1390_v25 = vadd.f32 %v1389_v21, %v1388_v23 }
 0x637   :  { %2208 = vtanh.f32 %v1390_v25  ;;  %v1577_v52 = vrot.slane %v1390_v25, 7 }
 0x641   :  { %v2209_v27 = vpop.eup %2208 }
 0x642   :  { %v1392_v28 = vmul.f32 %v2209_v27, %v2207_v26 }
 0x644   :  { %1394 = vst.msk [vmem:[#allocation2] sm:$0x20] %vm1393_vm8, %v1392_v28  ;;  %v1396_v29 = vrot.slane %v1392_v28, 5 }
 0x646   :  { %1941 = vmatmul.mubr.msk.f32.vlgmr.msra.gmra.mrb[12].mxu0 %vm265_vm2, %v1396_v29  ;;  %1942 = vmatmul.mubr.msk.f32.vlgmr.msra.gmra.mrb[16].mxu1 %vm265_vm2, %v1396_v29 }
 0x647   :  { %2085 = vmatpush1.bf16.msra.mxu0 %v2407_v15  ;;  %2093 = vmatpush1.bf16.msra.mxu1 %v2430_v35 }
 0x648   :  { %2087 = vmatprep.subr.bf16.mxu0 %v2410_v20  ;;  %2095 = vmatprep.subr.bf16.mxu1 %v2433_v36 }
 0x649   :  { %1654 = vmatprep.mubr.f32.mxu0 %v2322_v4  ;;  %1725 = vmatprep.mubr.f32.mxu1 %v2322_v4 }
 0x64b   :  { %2089 = vmatpush1.bf16.msra.mxu0 %v2413_v24  ;;  %2097 = vmatpush1.bf16.msra.mxu1 %v2441_v39 }
 0x64c   :  { %2098 = vmatprep.subr.bf16.mxu0 %v2323_v6 }
 0x719   :  { %v1465_v30 = vpop.f32.mrb[12].mxu0  ;;  %v1536_v32 = vpop.f32.mrb[16].mxu1 }
 0x71a   :  { %v1545_v33 = vrot.slane %v1465_v30, 2  ;;  %v1467_v34 = vpop.f32.mrb[13].mxu0  ;;  %v1538_v37 = vpop.f32.mrb[17].mxu1  ;;  %v1547_v24 = vrot.slane %v1536_v32, 2 }
 0x71b   :  { %v1546_v15 = vrot.slane %v1467_v34, 2  ;;  %v1548_v40 = vrot.slane %v1538_v37, 2 }
 0x71c   :  { %v1553_v35 = vadd.f32 %v1545_v33, %v2462_v46  ;;  %v1555_v39 = vadd.f32 %v1547_v24, %v2472_v62 }
 0x71d   :  { %v1554_v20 = vadd.f32 %v1546_v15, %v2464_v48  ;;  %v1556_v41 = vadd.f32 %v1548_v40, %v2470_v61 }
 0x71e   :  { %v1943_v38 = vmul.f32 -1.442695, %v1553_v35 }
 0x71f   :  { %v1944_v36 = vmul.f32 -1.442695, %v1554_v20  ;;  %v1945_v42 = vmul.f32 -1.442695, %v1556_v41 }
 0x720   :  { %2210 = vpow2.f32 %v1943_v38 }
 0x721   :  { %2212 = vpow2.f32 %v1944_v36 }
 0x722   :  { %2214 = vpow2.f32 %v1945_v42 }
 0x723   :  { %2216 = vtanh.f32 %v1555_v39 }
 0x72a   :  { %v2211_v43 = vpop.eup %2210 }
 0x72b   :  { %v2213_v44 = vpop.eup %2212  ;;  %v1560_v45 = vadd.f32 1.0, %v2211_v43 }
 0x72c   :  { %v1566_v47 = vadd.f32 1.0, %v2213_v44  ;;  %v2215_v49 = vpop.eup %2214 }
 0x72d   :  { %2218 = vrcp.f32 %v1560_v45  ;;  %v2217_v50 = vpop.eup %2216  ;;  %v1573_v55 = vadd.f32 1.0, %v2215_v49 }
 0x72e   :  { %2220 = vrcp.f32 %v1566_v47 }
 0x72f   :  { %2222 = vrcp.f32 %v1573_v55 }
 0x737   :  { %v2219_v51 = vpop.eup %2218 }
 0x738   :  { %v2221_v53 = vpop.eup %2220  ;;  %v1580_v54 = vmul.f32 %v2219_v51, %v2217_v50 }
 0x739   :  { %v1579_v56 = vmul.f32 %v2221_v53, %v1577_v52  ;;  %v2223_v58 = vpop.eup %2222 }
 0x73b   :  { %v1581_v57 = vadd.f32 %v1580_v54, %v1579_v56 }
 0x73d   :  { %2224 = vtanh.f32 %v1581_v57  ;;  %v1768_v29 = vrot.slane %v1581_v57, 7 }
 0x747   :  { %v2225_v59 = vpop.eup %2224 }
 0x748   :  { %v1583_v60 = vmul.f32 %v2225_v59, %v2223_v58 }
 0x74a   :  { %1585 = vst.msk [vmem:[#allocation2] sm:$0x40] %vm1584_vm9, %v1583_v60  ;;  %v1587_v63 = vrot.slane %v1583_v60, 6 }
 0x74c   :  { %1946 = vmatmul.mubr.msk.f32.vlgmr.msra.gmra.mrb[14].mxu0 %vm265_vm2, %v1587_v63  ;;  %1947 = vmatmul.mubr.msk.f32.vlgmr.msra.gmra.mrb[18].mxu1 %vm265_vm2, %v1587_v63 }
 0x74d   :  { %1967 = vmatprep.mubr.msk.f32.mxu0 %vm2324_vm10, %v2322_v4  ;;  %2100 = vmatpush3.bf16.msra.mxu0 %v2099_v2 }
 0x74e   :  { %2101 = vmatprep.subr.bf16.mxu0 %v2323_v6 }
 0x751   :  { %2103 = vmatpush3.bf16.msra.mxu0 %v2102_v7 }
 0x81f   :  { %v1656_v11 = vpop.f32.mrb[14].mxu0  ;;  %v1727_v8 = vpop.f32.mrb[18].mxu1 }
 0x820   :  { %v1736_v31 = vrot.slane %v1656_v11, 1  ;;  %v1658_v9 = vpop.f32.mrb[15].mxu0  ;;  %v1729_v10 = vpop.f32.mrb[19].mxu1  ;;  %v1738_v19 = vrot.slane %v1727_v8, 1 }
 0x821   :  { %v1737_v12 = vrot.slane %v1658_v9, 1  ;;  %v1739_v18 = vrot.slane %v1729_v10, 1 }
 0x822   :  { %v1744_v13 = vadd.f32 %v1736_v31, %v2462_v46  ;;  %v1746_v22 = vadd.f32 %v1738_v19, %v2472_v62 }
 0x823   :  { %v1745_v14 = vadd.f32 %v1737_v12, %v2464_v48  ;;  %v1747_v4 = vadd.f32 %v1739_v18, %v2470_v61 }
 0x824   :  { %v1948_v16 = vmul.f32 -1.442695, %v1744_v13 }
 0x825   :  { %v1949_v17 = vmul.f32 -1.442695, %v1745_v14  ;;  %v1950_v21 = vmul.f32 -1.442695, %v1747_v4 }
 0x826   :  { %2226 = vpow2.f32 %v1948_v16 }
 0x827   :  { %2228 = vpow2.f32 %v1949_v17 }
 0x828   :  { %2230 = vpow2.f32 %v1950_v21 }
 0x829   :  { %2232 = vtanh.f32 %v1746_v22 }
 0x830   :  { %v2227_v23 = vpop.eup %2226 }
 0x831   :  { %v2229_v25 = vpop.eup %2228  ;;  %v1751_v26 = vadd.f32 1.0, %v2227_v23 }
 0x832   :  { %v1757_v27 = vadd.f32 1.0, %v2229_v25  ;;  %v2231_v46 = vpop.eup %2230 }
 0x833   :  { %2234 = vrcp.f32 %v1751_v26  ;;  %v2233_v48 = vpop.eup %2232  ;;  %v1764_v33 = vadd.f32 1.0, %v2231_v46 }
 0x834   :  { %2236 = vrcp.f32 %v1757_v27 }
 0x835   :  { %2238 = vrcp.f32 %v1764_v33 }
 0x83d   :  { %v2235_v28 = vpop.eup %2234 }
 0x83e   :  { %v2237_v30 = vpop.eup %2236  ;;  %v1771_v32 = vmul.f32 %v2235_v28, %v2233_v48 }
 0x83f   :  { %v1770_v61 = vmul.f32 %v2237_v30, %v1768_v29  ;;  %v2239_v62 = vpop.eup %2238 }
 0x841   :  { %v1772_v34 = vadd.f32 %v1771_v32, %v1770_v61 }
 0x843   :  { %2240 = vtanh.f32 %v1772_v34  ;;  %1871 = vst.msk [vmem:[#allocation8 - $0x7] sm:$0x80] %vm1775_vm11, %v1772_v34 }
 0x84d   :  { %v2241_v37 = vpop.eup %2240 }
 0x84e   :  { %v1774_v15 = vmul.f32 %v2241_v37, %v2239_v62 }
 0x850   :  { %1776 = vst.msk [vmem:[#allocation2] sm:$0x80] %vm1775_vm11, %v1774_v15  ;;  %1870 = vst.msk [vmem:[#allocation7 - $0x7] sm:$0x80] %vm1775_vm11, %v1774_v15 }
 0x857   :  { %v1777_v35 = vld [vmem:[#allocation2] sm:$0xff] }
 0x858   :  { %1968 = vmatmul.mubr.msk.f32.vlgmr.msra.gmra.mrb[16].mxu0 %vm265_vm2, %v1777_v35 }
 0x859   :  { %2279 = shalt.err (!%p2276_p12)
}
 0x85a   :  { %s2280_s26 = scalar_lea.hbm %s2629_s9, 16 }
 0x85b   :  { %p2281_p13 = scmp.ne.s32.totalorder %s2629_s9, %s2280_s26  ;;  %p2284_p0 = scmp.lt.u32.totalorder %s2280_s26, %s2629_s9 }
 0x85d   :  { %p2286_p1 = pnand %p2284_p0, %p2281_p13 }
 0x85f   :  { %2289 = shalt.err (!%p2286_p1)
}
 0x860   :  { %1883 = dma.vmem_to_hbm [thread:$0]  %s1881_s20, 16, %s2629_s9, [#allocation6]  }
 0x861   :  { %s2290_s11 = scalar_lea.vmem %s1891_s22, 16  ;;  %s2294_s0 = scalar_lea.vmem %s1891_s22, 32 }
 0x862   :  { %p2291_p2 = scmp.ne.s32.totalorder %s1891_s22, %s2290_s11  ;;  %p2295_p3 = scmp.lt.s32.totalorder %s1891_s22, %s1891_s22 }
 0x863   :  { %p2296_p4 = scmp.lt.s32.totalorder %s2294_s0, %s2290_s11 }
 0x865   :  { %p2297_p5 = por %p2296_p4, %p2295_p3 }
 0x867   :  { %p2298_p6 = pnand %p2297_p5, %p2291_p2 }
 0x869   :  { %2301 = shalt.err (!%p2298_p6)
}
 0x86a   :  { %s2302_s12 = scalar_lea.hbm %s2630_s10, 16 }
 0x86b   :  { %p2303_p7 = scmp.ne.s32.totalorder %s2630_s10, %s2302_s12  ;;  %p2306_p8 = scmp.lt.u32.totalorder %s2302_s12, %s2630_s10 }
 0x86d   :  { %p2308_p9 = pnand %p2306_p8, %p2303_p7 }
 0x86f   :  { %2311 = shalt.err (!%p2308_p9)
}
 0x870   :  { %1893 = dma.vmem_to_hbm [thread:$0]  %s1891_s22, 16, %s2630_s10, [#allocation9]   ;;  %v1951_v20 = vld [vmem:[#allocation3] ss:$0 sm:$0xff]  ;;  %vm1868_vm12 = vcmask 7168  }
 0x92b   :  { %v1858_v38 = vpop.f32.mrb[16].mxu0 }
 0x92c   :  { %v1859_v36 = vadd.f32 %v1951_v20, %v1858_v38  ;;  %v1969_v40 = vpop.f32.mrb[17].mxu0 }
 0x92e   :  { %v1953_v41 = vmul.f32 -1.442695, %v1859_v36 }
 0x930   :  { %2242 = vpow2.f32 %v1953_v41 }
 0x93a   :  { %v2243_v24 = vpop.eup %2242 }
 0x93b   :  { %v1865_v42 = vadd.f32 1.0, %v2243_v24 }
 0x93d   :  { %2244 = vrcp.f32 %v1865_v42 }
 0x947   :  { %v2245_v39 = vpop.eup %2244 }
 0x948   :  { %1869 = vst.msk [vmem:[%s2628_s8] sm:$0xff] %vm1868_vm12, %v2245_v39 }
 0x949   :  { %2314 = dma.done.wait [#allocation6], 16  }
 0x94a   :  { %2315 = vsyncadd [#allocation6], 4294967280 }
 0x94b   :  { %2316 = dma.done.wait [#allocation9], 16  }
 0x94c   :  { %2317 = vsyncadd [#allocation9], 4294967280 }
 0x94d   :  { %1902 = vsyncpa [#allocation5], 1 }
 0x94e   :  { %1903 = vsyncpa [#allocation6], 1 }
 0x94f   :  { %1904 = vsyncpa [#allocation9], 1 }

</bundles_post_ra>
